<compile_context>
chip_gen: v6e
topology: v6e:2x2x1
jax: 0.10.0
libtpu: 0.0.40
codegen_flags: <defaults>
</compile_context>

<pallas_src>
import jax
import jax.numpy as jnp
import numpy as np
from jax import lax
from jax.experimental import pallas as pl
from jax.experimental.pallas import tpu as pltpu


# --------------------------------------------------------------------------
# One-time, param-only preprocessing (hoisted out of the per-call hot path).
# --------------------------------------------------------------------------
def fold_decoder2d_params(params, input_hw_actual, kernel_size=2):
    """Fold conv2 ∘ PixelShuffle ∘ conv1 (+ the pad=1 border) into per-output-pixel
    tables, and build the 0/1 expansion matrix that maps input pixels to output
    pixels.  Call ONCE per parameter set; returns ready device arrays:
      wl: (Cin, Cout, Spad)  per-pixel folded weights (0 on border / pad lanes)
      bl: (Cout, Spad)       per-pixel folded bias (b2 on border, 0 on pad lanes)
      E : (H*W, Spad)        0/1 expansion matrix (all-zero cols on border / pad)
    """
    H, W = input_hw_actual
    r = kernel_size
    w1, b1 = params["w1"], params["b1"]          # (Cin*r^2, Cin), (Cin*r^2,)
    w2, b2 = params["w2"], params["b2"]          # (Cout, Cin), (Cout,)
    Cin = w1.shape[1]
    Cout = w2.shape[0]
    OH, OW = r * H + 2, r * W + 2
    S = OH * OW
    Spad = ((S + 127) // 128) * 128              # lane-dense output stores
    hp = lax.Precision.HIGHEST

    # conv1 out-channel m = c*r*r + i*r + j feeds pixel-shuffle channel c at phase (i,j);
    # conv2 then mixes c -> o.
    w1r = w1.reshape(Cin, r, r, Cin)                                   # [c,i,j,cin]
    wc = jnp.einsum("oc,cijk->oijk", w2, w1r, precision=hp)            # (Cout,r,r,Cin)
    bc = jnp.einsum("oc,cij->oij", w2, b1.reshape(Cin, r, r),
                    precision=hp) + b2[:, None, None]                  # (Cout,r,r)

    oh = jnp.arange(OH)
    ow = jnp.arange(OW)
    in_h = (oh >= 1) & (oh <= r * H)
    in_w = (ow >= 1) & (ow <= r * W)
    interior = in_h[:, None] & in_w[None, :]                           # (OH, OW)
    i_idx = jnp.where(in_h, (oh - 1) % r, 0)
    j_idx = jnp.where(in_w, (ow - 1) % r, 0)
    ih = jnp.where(in_h, (oh - 1) // r, 0)
    iw = jnp.where(in_w, (ow - 1) // r, 0)

    # Per-output-pixel weight / bias tables.
    wl = jnp.transpose(wc, (3, 0, 1, 2))[:, :, i_idx[:, None], j_idx[None, :]]
    wl = jnp.where(interior[None, None], wl, 0.0).reshape(Cin, Cout, S)
    bl = bc[:, i_idx[:, None], j_idx[None, :]]
    bl = jnp.where(interior[None], bl, b2[:, None, None]).reshape(Cout, S)

    # 0/1 expansion matrix: output pixel s reads input pixel sin[s]; border -> zero column.
    sin = (ih[:, None] * W + iw[None, :]).reshape(S)
    E = ((sin[:, None] == jnp.arange(H * W)[None, :]) & interior.reshape(S, 1))
    E = E.astype(jnp.float32).T                                        # (H*W, S)

    pad = Spad - S
    if pad:
        # exact zeros in the pad lanes -> those lanes compute to 0 and do not perturb
        # the LayerNorm sums; the wrapper slices them off.
        wl = jnp.pad(wl, ((0, 0), (0, 0), (0, pad)))
        bl = jnp.pad(bl, ((0, 0), (0, pad)))
        E = jnp.pad(E, ((0, 0), (0, pad)))
    return {"wl": wl, "bl": bl, "E": E}


# --------------------------------------------------------------------------
# Fused kernel (one grid step handles Bt samples stacked on sublanes):
#   x_ref : (Bt*Cin, HW)     raw input pixels
#   e_ref : (HW, Spad)       0/1 expansion matrix (shared)
#   wl_ref: (Cin, Cout, Spad) folded per-pixel weights (shared)
#   bl_ref: (Cout, Spad)     folded per-pixel bias (shared)
#   o_ref : (Bt*Cout, Spad)  final activations, lane-dense
# --------------------------------------------------------------------------
def _make_decoder2d_kernel(Bt, Cin, Cout, n_valid):
    inv_n = 1.0 / float(n_valid)

    def kernel(x_ref, e_ref, wl_ref, bl_ref, o_ref):
        # (a) nearest pixel-shuffle-phase expansion + zero pad, as ONE small MXU matmul
        #     against the constant 0/1 matrix (exact: each column selects <=1 input).
        xu = jnp.dot(x_ref[...], e_ref[...],
                     preferred_element_type=jnp.float32)        # (Bt*Cin, Spad)
        bl = bl_ref[...]                                        # (Cout, Spad)
        for b in range(Bt):
            # (b) folded 1x1 convs: tiny Cin-term contraction on the VPU (not the MXU).
            y = bl
            for c in range(Cin):
                row = b * Cin + c
                y = y + wl_ref[c] * xu[row:row + 1, :]          # (Cout,Spad)+=(Cout,Spad)*(1,Spad)
            # (c) LayerNorm over the whole sample; one-pass stats (pad lanes are exact 0).
            s1 = jnp.sum(jnp.sum(y, axis=1, keepdims=True), axis=0, keepdims=True)
            s2 = jnp.sum(jnp.sum(y * y, axis=1, keepdims=True), axis=0, keepdims=True)
            mean = s1 * inv_n
            var = s2 * inv_n - mean * mean                      # biased var (PyTorch LayerNorm)
            y = (y - mean) * lax.rsqrt(var + 1e-5)
            # (d) ReLU6; full-lane (unmasked) store of this sample's (Cout, Spad) slab.
            o_ref[pl.ds(b * Cout, Cout), :] = jnp.clip(y, 0.0, 6.0)

    return kernel


def decoder2d_forward(x, folded, kernel_size=2, batch_tile=None):
    """x: (B, Cin, H, W) float32 NCHW; folded: output of fold_decoder2d_params.
    Returns (B, Cout, k*H+2, k*W+2) NCHW."""
    B, Cin, H, W = x.shape
    r = kernel_size
    wl, bl, E = folded["wl"], folded["bl"], folded["E"]
    Cout, Spad = bl.shape
    HW = E.shape[0]
    OH, OW = r * H + 2, r * W + 2
    S = OH * OW
    assert HW == H * W and wl.shape == (Cin, Cout, Spad)

    # Single grid step for small batches (best on 1-TC v5e/v6e and fills all 8
    # sublanes of the MAC input tile).  For large B, pass batch_tile to tile the
    # batch (grid = B // Bt); keep Bt*Cin a multiple of 8 for aligned blocks.
    Bt = B if batch_tile is None else batch_tile
    assert B % Bt == 0, "batch_tile must divide B"
    assert (Bt * Cin) % 8 == 0 or Bt == B, \
        "Bt*Cin should be a multiple of 8 (or Bt == B) for sublane-aligned blocks"

    x2 = x.reshape(B * Cin, HW)          # free reshape: batch/channel stacked on sublanes

    kernel = _make_decoder2d_kernel(Bt, Cin, Cout, n_valid=Cout * S)
    out = pl.pallas_call(
        kernel,
        out_shape=jax.ShapeDtypeStruct((B * Cout, Spad), jnp.float32),
        grid=(B // Bt,),
        in_specs=[
            pl.BlockSpec((Bt * Cin, HW), lambda i: (i, 0)),        # per-step samples
            pl.BlockSpec((HW, Spad), lambda i: (0, 0)),            # shared expansion matrix
            pl.BlockSpec((Cin, Cout, Spad), lambda i: (0, 0, 0)),  # shared folded weights
            pl.BlockSpec((Cout, Spad), lambda i: (0, 0)),          # shared folded bias
        ],
        out_specs=pl.BlockSpec((Bt * Cout, Spad), lambda i: (i, 0)),
        compiler_params=pltpu.CompilerParams(dimension_semantics=("parallel",)),
    )(x2, E, wl, bl)

    # Already in (B, Cout, pixels) order: slice off lane padding, reshape to NCHW.
    return out.reshape(B, Cout, Spad)[:, :, :S].reshape(B, Cout, OH, OW)


# --------------------------------------------------------------------------
# Pure-JAX reference (mirrors the PyTorch forward) for a correctness check.
# --------------------------------------------------------------------------
def decoder2d_reference(x, params, kernel_size=2):
    B, Cin, H, W = x.shape
    r = kernel_size
    w1, b1, w2, b2 = params["w1"], params["b1"], params["w2"], params["b2"]
    hp = lax.Precision.HIGHEST
    y1 = jnp.einsum("bchw,oc->bohw", x, w1, precision=hp) + b1[None, :, None, None]
    y1 = y1.reshape(B, Cin, r, r, H, W)
    y2 = jnp.transpose(y1, (0, 1, 4, 2, 5, 3)).reshape(B, Cin, H * r, W * r)
    y2p = jnp.pad(y2, ((0, 0), (0, 0), (1, 1), (1, 1)))
    y3 = jnp.einsum("bchw,oc->bohw", y2p, w2, precision=hp) + b2[None, :, None, None]
    mean = jnp.mean(y3, axis=(1, 2, 3), keepdims=True)
    var = jnp.mean((y3 - mean) ** 2, axis=(1, 2, 3), keepdims=True)
    y4 = (y3 - mean) / jnp.sqrt(var + 1e-5)
    return jnp.clip(y4, 0.0, 6.0)


if __name__ == "__main__":
    B, Cin, Cout, K = 2, 4, 8, 2
    H = W = 7  # actual input spatial; module conceptually built with input_hw=(8, 8) (see NOTE)

    key = jax.random.PRNGKey(0)
    k1, k2, k3, k4, k5 = jax.random.split(key, 5)
    params = {
        "w1": 0.2 * jax.random.normal(k1, (Cin * K * K, Cin), jnp.float32),
        "b1": 0.1 * jax.random.normal(k2, (Cin * K * K,), jnp.float32),
        "w2": 0.2 * jax.random.normal(k3, (Cout, Cin), jnp.float32),
        "b2": 0.1 * jax.random.normal(k4, (Cout,), jnp.float32),
    }
    x = jax.random.normal(k5, (B, Cin, H, W), jnp.float32)

    # One-time, param-only preprocessing (hoisted out of the hot path).
    folded = fold_decoder2d_params(params, (H, W), kernel_size=K)
    folded = jax.tree_util.tree_map(jax.block_until_ready, folded)

    fwd = jax.jit(decoder2d_forward, static_argnames=("kernel_size", "batch_tile"))
    out = jax.block_until_ready(fwd(x, folded, kernel_size=K))

    ref = jax.block_until_ready(decoder2d_reference(x, params, kernel_size=K))
    assert out.shape == (B, Cout, K * H + 2, K * W + 2), out.shape
    np.testing.assert_allclose(np.asarray(out), np.asarray(ref), rtol=1e-3, atol=1e-3)

    print("KERNEL_OK")
</pallas_src>

<mosaic_0001>
module attributes {stable_mosaic.version = 11 : i64} {
  func.func @kernel(%arg0: i32, %arg1: memref<8x49xf32, #tpu.memory_space<vmem>>, %arg2: memref<49x256xf32, #tpu.memory_space<vmem>>, %arg3: memref<4x8x256xf32, #tpu.memory_space<vmem>>, %arg4: memref<8x256xf32, #tpu.memory_space<vmem>>, %arg5: memref<16x256xf32, #tpu.memory_space<vmem>>) attributes {dimension_semantics = [#tpu.dimension_semantics<parallel>], iteration_bounds = array<i64: 1>, scalar_prefetch = 0 : i64, scratch_operands = 0 : i64, tpu.core_type = #tpu.core_type<tc>, window_params = [{transform_indices = @transform_0, window_bounds = array<i64: 8, 49>}, {pipeline_mode = #tpu.pipeline_mode<synchronous>, transform_indices = @transform_1, window_bounds = array<i64: 49, 256>}, {pipeline_mode = #tpu.pipeline_mode<synchronous>, transform_indices = @transform_2, window_bounds = array<i64: 4, 8, 256>}, {pipeline_mode = #tpu.pipeline_mode<synchronous>, transform_indices = @transform_3, window_bounds = array<i64: 8, 256>}, {transform_indices = @transform_4, window_bounds = array<i64: 16, 256>}]} {
    %c0 = arith.constant 0 : index
    %c0_0 = arith.constant 0 : index
    %0 = vector.load %arg1[%c0, %c0_0] : memref<8x49xf32, #tpu.memory_space<vmem>>, vector<8x49xf32>
    %c0_1 = arith.constant 0 : index
    %c0_2 = arith.constant 0 : index
    %1 = vector.load %arg2[%c0_1, %c0_2] : memref<49x256xf32, #tpu.memory_space<vmem>>, vector<49x256xf32>
    %cst = arith.constant dense<0.000000e+00> : vector<8x256xf32>
    %2 = tpu.matmul %0, %1, %cst {dimension_numbers = #tpu.dot_dimension_numbers<[1], [0], [0], [1], [0, 0, 1, 1], [], []>} : vector<8x49xf32>, vector<49x256xf32>, vector<8x256xf32> -> vector<8x256xf32>
    %c0_3 = arith.constant 0 : index
    %c0_4 = arith.constant 0 : index
    %3 = vector.load %arg4[%c0_3, %c0_4] : memref<8x256xf32, #tpu.memory_space<vmem>>, vector<8x256xf32>
    %c0_5 = arith.constant 0 : index
    %c0_6 = arith.constant 0 : index
    %c0_7 = arith.constant 0 : index
    %4 = vector.load %arg3[%c0_5, %c0_6, %c0_7] : memref<4x8x256xf32, #tpu.memory_space<vmem>>, vector<1x8x256xf32>
    %5 = vector.shape_cast %4 : vector<1x8x256xf32> to vector<8x256xf32>
    %6 = vector.extract_strided_slice %2 {offsets = [0, 0], sizes = [1, 256], strides = [1, 1]} : vector<8x256xf32> to vector<1x256xf32>
    %7 = vector.broadcast %6 : vector<1x256xf32> to vector<8x256xf32>
    %8 = arith.mulf %5, %7 : vector<8x256xf32>
    %9 = arith.addf %3, %8 : vector<8x256xf32>
    %c1 = arith.constant 1 : index
    %c0_8 = arith.constant 0 : index
    %c0_9 = arith.constant 0 : index
    %10 = vector.load %arg3[%c1, %c0_8, %c0_9] : memref<4x8x256xf32, #tpu.memory_space<vmem>>, vector<1x8x256xf32>
    %11 = vector.shape_cast %10 : vector<1x8x256xf32> to vector<8x256xf32>
    %12 = vector.extract_strided_slice %2 {offsets = [1, 0], sizes = [1, 256], strides = [1, 1]} : vector<8x256xf32> to vector<1x256xf32>
    %13 = vector.broadcast %12 : vector<1x256xf32> to vector<8x256xf32>
    %14 = arith.mulf %11, %13 : vector<8x256xf32>
    %15 = arith.addf %9, %14 : vector<8x256xf32>
    %c2 = arith.constant 2 : index
    %c0_10 = arith.constant 0 : index
    %c0_11 = arith.constant 0 : index
    %16 = vector.load %arg3[%c2, %c0_10, %c0_11] : memref<4x8x256xf32, #tpu.memory_space<vmem>>, vector<1x8x256xf32>
    %17 = vector.shape_cast %16 : vector<1x8x256xf32> to vector<8x256xf32>
    %18 = vector.extract_strided_slice %2 {offsets = [2, 0], sizes = [1, 256], strides = [1, 1]} : vector<8x256xf32> to vector<1x256xf32>
    %19 = vector.broadcast %18 : vector<1x256xf32> to vector<8x256xf32>
    %20 = arith.mulf %17, %19 : vector<8x256xf32>
    %21 = arith.addf %15, %20 : vector<8x256xf32>
    %c3 = arith.constant 3 : index
    %c0_12 = arith.constant 0 : index
    %c0_13 = arith.constant 0 : index
    %22 = vector.load %arg3[%c3, %c0_12, %c0_13] : memref<4x8x256xf32, #tpu.memory_space<vmem>>, vector<1x8x256xf32>
    %23 = vector.shape_cast %22 : vector<1x8x256xf32> to vector<8x256xf32>
    %24 = vector.extract_strided_slice %2 {offsets = [3, 0], sizes = [1, 256], strides = [1, 1]} : vector<8x256xf32> to vector<1x256xf32>
    %25 = vector.broadcast %24 : vector<1x256xf32> to vector<8x256xf32>
    %26 = arith.mulf %23, %25 : vector<8x256xf32>
    %27 = arith.addf %21, %26 : vector<8x256xf32>
    %cst_14 = arith.constant dense<0.000000e+00> : vector<8xf32>
    %28 = vector.multi_reduction <add>, %27, %cst_14 [1] : vector<8x256xf32> to vector<8xf32>
    %29 = vector.shape_cast %28 : vector<8xf32> to vector<8x1xf32>
    %cst_15 = arith.constant dense<0.000000e+00> : vector<1xf32>
    %30 = vector.multi_reduction <add>, %29, %cst_15 [0] : vector<8x1xf32> to vector<1xf32>
    %31 = vector.shape_cast %30 : vector<1xf32> to vector<1x1xf32>
    %32 = arith.mulf %27, %27 : vector<8x256xf32>
    %cst_16 = arith.constant dense<0.000000e+00> : vector<8xf32>
    %33 = vector.multi_reduction <add>, %32, %cst_16 [1] : vector<8x256xf32> to vector<8xf32>
    %34 = vector.shape_cast %33 : vector<8xf32> to vector<8x1xf32>
    %cst_17 = arith.constant dense<0.000000e+00> : vector<1xf32>
    %35 = vector.multi_reduction <add>, %34, %cst_17 [0] : vector<8x1xf32> to vector<1xf32>
    %36 = vector.shape_cast %35 : vector<1xf32> to vector<1x1xf32>
    %cst_18 = arith.constant 4.8828125E-4 : f32
    %37 = vector.broadcast %cst_18 : f32 to vector<1x1xf32>
    %38 = arith.mulf %31, %37 : vector<1x1xf32>
    %cst_19 = arith.constant 4.8828125E-4 : f32
    %39 = vector.broadcast %cst_19 : f32 to vector<1x1xf32>
    %40 = arith.mulf %36, %39 : vector<1x1xf32>
    %41 = arith.mulf %38, %38 : vector<1x1xf32>
    %42 = arith.subf %40, %41 : vector<1x1xf32>
    %43 = vector.broadcast %38 : vector<1x1xf32> to vector<8x256xf32>
    %44 = arith.subf %27, %43 : vector<8x256xf32>
    %cst_20 = arith.constant 9.99999974E-6 : f32
    %45 = vector.broadcast %cst_20 : f32 to vector<1x1xf32>
    %46 = arith.addf %42, %45 : vector<1x1xf32>
    %47 = math.rsqrt %46 : vector<1x1xf32>
    %48 = vector.broadcast %47 : vector<1x1xf32> to vector<8x256xf32>
    %49 = arith.mulf %44, %48 : vector<8x256xf32>
    %cst_21 = arith.constant 0.000000e+00 : f32
    %cst_22 = arith.constant 6.000000e+00 : f32
    %50 = vector.broadcast %cst_21 : f32 to vector<8x256xf32>
    %51 = arith.maximumf %50, %49 : vector<8x256xf32>
    %52 = vector.broadcast %cst_22 : f32 to vector<8x256xf32>
    %53 = arith.minimumf %52, %51 : vector<8x256xf32>
    %c0_23 = arith.constant 0 : index
    %c0_24 = arith.constant 0 : index
    %54 = vector.load %arg5[%c0_23, %c0_24] : memref<16x256xf32, #tpu.memory_space<vmem>>, vector<8x256xf32>
    tpu.vector_store %arg5[%c0_23, %c0_24], %53 {strides = array<i32>} : memref<16x256xf32, #tpu.memory_space<vmem>>, vector<8x256xf32>,
    %c0_25 = arith.constant 0 : index
    %c0_26 = arith.constant 0 : index
    %c0_27 = arith.constant 0 : index
    %55 = vector.load %arg3[%c0_25, %c0_26, %c0_27] : memref<4x8x256xf32, #tpu.memory_space<vmem>>, vector<1x8x256xf32>
    %56 = vector.shape_cast %55 : vector<1x8x256xf32> to vector<8x256xf32>
    %57 = vector.extract_strided_slice %2 {offsets = [4, 0], sizes = [1, 256], strides = [1, 1]} : vector<8x256xf32> to vector<1x256xf32>
    %58 = vector.broadcast %57 : vector<1x256xf32> to vector<8x256xf32>
    %59 = arith.mulf %56, %58 : vector<8x256xf32>
    %60 = arith.addf %3, %59 : vector<8x256xf32>
    %c1_28 = arith.constant 1 : index
    %c0_29 = arith.constant 0 : index
    %c0_30 = arith.constant 0 : index
    %61 = vector.load %arg3[%c1_28, %c0_29, %c0_30] : memref<4x8x256xf32, #tpu.memory_space<vmem>>, vector<1x8x256xf32>
    %62 = vector.shape_cast %61 : vector<1x8x256xf32> to vector<8x256xf32>
    %63 = vector.extract_strided_slice %2 {offsets = [5, 0], sizes = [1, 256], strides = [1, 1]} : vector<8x256xf32> to vector<1x256xf32>
    %64 = vector.broadcast %63 : vector<1x256xf32> to vector<8x256xf32>
    %65 = arith.mulf %62, %64 : vector<8x256xf32>
    %66 = arith.addf %60, %65 : vector<8x256xf32>
    %c2_31 = arith.constant 2 : index
    %c0_32 = arith.constant 0 : index
    %c0_33 = arith.constant 0 : index
    %67 = vector.load %arg3[%c2_31, %c0_32, %c0_33] : memref<4x8x256xf32, #tpu.memory_space<vmem>>, vector<1x8x256xf32>
    %68 = vector.shape_cast %67 : vector<1x8x256xf32> to vector<8x256xf32>
    %69 = vector.extract_strided_slice %2 {offsets = [6, 0], sizes = [1, 256], strides = [1, 1]} : vector<8x256xf32> to vector<1x256xf32>
    %70 = vector.broadcast %69 : vector<1x256xf32> to vector<8x256xf32>
    %71 = arith.mulf %68, %70 : vector<8x256xf32>
    %72 = arith.addf %66, %71 : vector<8x256xf32>
    %c3_34 = arith.constant 3 : index
    %c0_35 = arith.constant 0 : index
    %c0_36 = arith.constant 0 : index
    %73 = vector.load %arg3[%c3_34, %c0_35, %c0_36] : memref<4x8x256xf32, #tpu.memory_space<vmem>>, vector<1x8x256xf32>
    %74 = vector.shape_cast %73 : vector<1x8x256xf32> to vector<8x256xf32>
    %75 = vector.extract_strided_slice %2 {offsets = [7, 0], sizes = [1, 256], strides = [1, 1]} : vector<8x256xf32> to vector<1x256xf32>
    %76 = vector.broadcast %75 : vector<1x256xf32> to vector<8x256xf32>
    %77 = arith.mulf %74, %76 : vector<8x256xf32>
    %78 = arith.addf %72, %77 : vector<8x256xf32>
    %cst_37 = arith.constant dense<0.000000e+00> : vector<8xf32>
    %79 = vector.multi_reduction <add>, %78, %cst_37 [1] : vector<8x256xf32> to vector<8xf32>
    %80 = vector.shape_cast %79 : vector<8xf32> to vector<8x1xf32>
    %cst_38 = arith.constant dense<0.000000e+00> : vector<1xf32>
    %81 = vector.multi_reduction <add>, %80, %cst_38 [0] : vector<8x1xf32> to vector<1xf32>
    %82 = vector.shape_cast %81 : vector<1xf32> to vector<1x1xf32>
    %83 = arith.mulf %78, %78 : vector<8x256xf32>
    %cst_39 = arith.constant dense<0.000000e+00> : vector<8xf32>
    %84 = vector.multi_reduction <add>, %83, %cst_39 [1] : vector<8x256xf32> to vector<8xf32>
    %85 = vector.shape_cast %84 : vector<8xf32> to vector<8x1xf32>
    %cst_40 = arith.constant dense<0.000000e+00> : vector<1xf32>
    %86 = vector.multi_reduction <add>, %85, %cst_40 [0] : vector<8x1xf32> to vector<1xf32>
    %87 = vector.shape_cast %86 : vector<1xf32> to vector<1x1xf32>
    %cst_41 = arith.constant 4.8828125E-4 : f32
    %88 = vector.broadcast %cst_41 : f32 to vector<1x1xf32>
    %89 = arith.mulf %82, %88 : vector<1x1xf32>
    %cst_42 = arith.constant 4.8828125E-4 : f32
    %90 = vector.broadcast %cst_42 : f32 to vector<1x1xf32>
    %91 = arith.mulf %87, %90 : vector<1x1xf32>
    %92 = arith.mulf %89, %89 : vector<1x1xf32>
    %93 = arith.subf %91, %92 : vector<1x1xf32>
    %94 = vector.broadcast %89 : vector<1x1xf32> to vector<8x256xf32>
    %95 = arith.subf %78, %94 : vector<8x256xf32>
    %cst_43 = arith.constant 9.99999974E-6 : f32
    %96 = vector.broadcast %cst_43 : f32 to vector<1x1xf32>
    %97 = arith.addf %93, %96 : vector<1x1xf32>
    %98 = math.rsqrt %97 : vector<1x1xf32>
    %99 = vector.broadcast %98 : vector<1x1xf32> to vector<8x256xf32>
    %100 = arith.mulf %95, %99 : vector<8x256xf32>
    %cst_44 = arith.constant 0.000000e+00 : f32
    %cst_45 = arith.constant 6.000000e+00 : f32
    %101 = vector.broadcast %cst_44 : f32 to vector<8x256xf32>
    %102 = arith.maximumf %101, %100 : vector<8x256xf32>
    %103 = vector.broadcast %cst_45 : f32 to vector<8x256xf32>
    %104 = arith.minimumf %103, %102 : vector<8x256xf32>
    %c8 = arith.constant 8 : index
    %c0_46 = arith.constant 0 : index
    %105 = vector.load %arg5[%c8, %c0_46] : memref<16x256xf32, #tpu.memory_space<vmem>>, vector<8x256xf32>
    tpu.vector_store %arg5[%c8, %c0_46], %104 {strides = array<i32>} : memref<16x256xf32, #tpu.memory_space<vmem>>, vector<8x256xf32>,
    return
  }
  func.func @transform_0(%arg0: i32) -> (i32, i32) {
    %c0_i32 = arith.constant 0 : i32
    %c0_i32_0 = arith.constant 0 : i32
    return %arg0, %c0_i32 : i32, i32
  }
  func.func @transform_1(%arg0: i32) -> (i32, i32) {
    %c0_i32 = arith.constant 0 : i32
    %c0_i32_0 = arith.constant 0 : i32
    %c0_i32_1 = arith.constant 0 : i32
    return %c0_i32, %c0_i32_0 : i32, i32
  }
  func.func @transform_2(%arg0: i32) -> (i32, i32, i32) {
    %c0_i32 = arith.constant 0 : i32
    %c0_i32_0 = arith.constant 0 : i32
    %c0_i32_1 = arith.constant 0 : i32
    %c0_i32_2 = arith.constant 0 : i32
    return %c0_i32, %c0_i32_0, %c0_i32_1 : i32, i32, i32
  }
  func.func @transform_3(%arg0: i32) -> (i32, i32) {
    %c0_i32 = arith.constant 0 : i32
    %c0_i32_0 = arith.constant 0 : i32
    %c0_i32_1 = arith.constant 0 : i32
    return %c0_i32, %c0_i32_0 : i32, i32
  }
  func.func @transform_4(%arg0: i32) -> (i32, i32) {
    %c0_i32 = arith.constant 0 : i32
    %c0_i32_0 = arith.constant 0 : i32
    return %arg0, %c0_i32 : i32, i32
  }
}

</mosaic_0001>

<bundles_post_ra>
// kernel: decoder2d_forward.1
= control target key start
LH: loop header
LB: loop body
LE: loop exit
PB: predicated region body
PF: predicated region fallthrough
CT: control target
= control target key end

     0   :  { %vm36_vm0 = vcmask 1040384   ;;  %v327_v3 = vmov 0.0   ;;  %vm32_vm1 = vcmask 400384   ;;  %v118_v16 = vlaneseq  ;;  %s464_s1 = inlined_call_operand.vmem [shape: f32[49,256], index: 1, kind: input, shape index: {}]   ;;  %s465_s0 = inlined_call_operand.vmem [shape: f32[8,49], index: 0, kind: input, shape index: {}]   ;;  %s466_s2 = inlined_call_operand.vmem [shape: f32[4,8,256], index: 2, kind: input, shape index: {}]   ;;  %s467_s3 = inlined_call_operand.vmem [shape: f32[8,256], index: 3, kind: input, shape index: {}]   ;;  %s468_s4 = inlined_call_operand.vmem [shape: f32[16,256], index: 4, kind: output, shape index: {}]  }
   0x1   :  { %v31_v0 = vld [vmem:[%s464_s1 + $0x68] sm:$0x1]  ;;  %v30_v1 = vld [vmem:[%s464_s1 + $0x60] sm:$0x1]  ;;  %v29_v2 = vld [vmem:[%s464_s1 + $0x58] sm:$0xff]  ;;  %107 = vmatprep.mubr.f32.mxu0 %v327_v3 }
   0x2   :  { %307 = vmatprep.subr.msk.mxu0 %vm36_vm0, %v31_v0  ;;  %v28_v4 = vld [vmem:[%s464_s1 + $0x50] sm:$0xff]  ;;  %v27_v5 = vld [vmem:[%s464_s1 + $0x48] sm:$0xff]  ;;  %v26_v6 = vld [vmem:[%s464_s1 + $0x40] sm:$0xff]  ;;  %v119_v17 = vshrl.u32 %v118_v16, 7 }
   0x3   :  { %308 = vmatpush1.msk.msra.mxu0 %vm36_vm0, %v30_v1  ;;  %v25_v7 = vld [vmem:[%s464_s1 + $0x38] sm:$0xff]  ;;  %v24_v8 = vld [vmem:[%s464_s1 + $0x30] sm:$0xff]  ;;  %v23_v9 = vld [vmem:[%s464_s1 + $0x28] sm:$0xff] }
   0x4   :  { %63 = vmatprep.subr.mxu0 %v29_v2  ;;  %v22_v10 = vld [vmem:[%s464_s1 + $0x20] sm:$0xff]  ;;  %v21_v11 = vld [vmem:[%s464_s1 + $0x18] sm:$0xff]  ;;  %v20_v12 = vld [vmem:[%s464_s1 + $0x10] sm:$0xff]  ;;  %v120_v18 = vsub.s32 0, %v119_v17  ;;  %v135_v19 = vsub.s32 1, %v119_v17  ;;  %v150_v20 = vsub.s32 2, %v119_v17 }
   0x5   :  { %64 = vmatpush1.msra.mxu0 %v28_v4  ;;  %v19_v13 = vld [vmem:[%s464_s1 + $0x8] sm:$0xff]  ;;  %v18_v14 = vld [vmem:[%s464_s1] sm:$0xff]  ;;  %v215_v21 = vsub.s32 4, %v119_v17  ;;  %v165_v22 = vsub.s32 3, %v119_v17  ;;  %v229_v23 = vsub.s32 5, %v119_v17  ;;  %v243_v26 = vsub.s32 6, %v119_v17 }
   0x6   :  { %65 = vmatprep.subr.mxu0 %v27_v5  ;;  %v17_v15 = vld [vmem:[%s465_s0] sm:$0xff]  ;;  %v257_v27 = vsub.s32 7, %v119_v17  ;;  %v310_v29 = vld [vmem:[%s466_s2 + $0x10] sm:$0xff]  ;;  %v117_v34 = vld [vmem:[%s466_s2 + $0x8] sm:$0xff] }
   0x7   :  { %66 = vmatpush1.msra.mxu0 %v26_v6  ;;  %v116_v25 = vld [vmem:[%s466_s2] sm:$0xff]  ;;  %v311_v42 = vld [vmem:[%s466_s2 + $0x18] sm:$0xff]  ;;  %v314_v44 = vld [vmem:[%s466_s2 + $0x30] sm:$0xff] }
   0x8   :  { %67 = vmatprep.subr.mxu0 %v25_v7  ;;  %v114_v33 = vld [vmem:[%s467_s3] sm:$0xff]  ;;  %v115_v45 = vld [vmem:[%s467_s3 + $0x8] sm:$0xff]  ;;  %v315_v62 = vld [vmem:[%s466_s2 + $0x38] sm:$0xff] }
   0x9   :  { %68 = vmatpush1.msra.mxu0 %v24_v8  ;;  %v312_v35 = vld [vmem:[%s466_s2 + $0x20] sm:$0xff]  ;;  %v313_v47 = vld [vmem:[%s466_s2 + $0x28] sm:$0xff] }
   0xa   :  { %69 = vmatprep.subr.mxu0 %v23_v9 }
   0xb   :  { %70 = vmatpush1.msra.mxu0 %v22_v10 }
   0xc   :  { %71 = vmatprep.subr.mxu0 %v21_v11 }
   0xd   :  { %72 = vmatpush1.msra.mxu0 %v20_v12 }
   0xe   :  { %73 = vmatprep.subr.mxu0 %v19_v13 }
   0xf   :  { %74 = vmatpush1.msra.mxu0 %v18_v14 }
  0x10   :  { %309 = vmatmul.mubr.msk.f32.vlgmr.msra.gmra.mxu0 %vm32_vm1, %v17_v15 }
  0xd0   :  { %v109_v24 = vpop.f32.mrf.mxu0 }
  0xd1   :  { %v121_v28 = vrot.slane %v109_v24, %v120_v18  ;;  %v136_v30 = vrot.slane %v109_v24, %v135_v19  ;;  %v151_v31 = vrot.slane %v109_v24, %v150_v20  ;;  %v166_v36 = vrot.slane %v109_v24, %v165_v22 }
  0xd2   :  { %v111_v32 = vpop.f32.mrf.mxu0  ;;  %v216_v37 = vrot.slane %v109_v24, %v215_v21  ;;  %v230_v38 = vrot.slane %v109_v24, %v229_v23  ;;  %v244_v49 = vrot.slane %v109_v24, %v243_v26  ;;  %v258_v50 = vrot.slane %v109_v24, %v257_v27 }
  0xd3   :  { %v220_v39 = vrot.slane %v111_v32, %v215_v21  ;;  %v125_v40 = vrot.slane %v111_v32, %v120_v18  ;;  %v126_v41 = vmul.f32 %v121_v28, %v116_v25  ;;  %v140_v43 = vrot.slane %v111_v32, %v135_v19 }
  0xd4   :  { %v141_v46 = vmul.f32 %v310_v29, %v136_v30  ;;  %v155_v48 = vrot.slane %v111_v32, %v150_v20  ;;  %v156_v53 = vmul.f32 %v312_v35, %v151_v31  ;;  %v170_v54 = vrot.slane %v111_v32, %v165_v22 }
  0xd5   :  { %v127_v51 = vmul.f32 %v125_v40, %v117_v34  ;;  %v128_v52 = vadd.f32 %v126_v41, %v114_v33  ;;  %v142_v55 = vmul.f32 %v311_v42, %v140_v43  ;;  %v171_v56 = vmul.f32 %v314_v44, %v166_v36 }
  0xd6   :  { %v221_v57 = vmul.f32 %v216_v37, %v116_v25  ;;  %v222_v58 = vmul.f32 %v220_v39, %v117_v34  ;;  %v157_v61 = vmul.f32 %v313_v47, %v155_v48  ;;  %v234_v63 = vrot.slane %v111_v32, %v229_v23 }
  0xd7   :  { %v129_v59 = vadd.f32 %v127_v51, %v115_v45  ;;  %v143_v60 = vadd.f32 %v141_v46, %v128_v52  ;;  %v235_v2 = vmul.f32 %v310_v29, %v230_v38  ;;  %v248_v3 = vrot.slane %v111_v32, %v243_v26 }
  0xd8   :  { %v223_v0 = vadd.f32 %v221_v57, %v114_v33  ;;  %v224_v1 = vadd.f32 %v222_v58, %v115_v45  ;;  %v236_v6 = vmul.f32 %v311_v42, %v234_v63  ;;  %v262_v7 = vrot.slane %v111_v32, %v257_v27 }
  0xd9   :  { %v144_v4 = vadd.f32 %v142_v55, %v129_v59  ;;  %v158_v5 = vadd.f32 %v156_v53, %v143_v60  ;;  %v172_v8 = vmul.f32 %v315_v62, %v170_v54  ;;  %v249_v10 = vmul.f32 %v312_v35, %v244_v49 }
  0xda   :  { %v237_v9 = vadd.f32 %v235_v2, %v223_v0  ;;  %v238_v13 = vadd.f32 %v236_v6, %v224_v1  ;;  %v250_v14 = vmul.f32 %v313_v47, %v248_v3  ;;  %v263_v18 = vmul.f32 %v314_v44, %v258_v50 }
  0xdb   :  { %v159_v11 = vadd.f32 %v157_v61, %v144_v4  ;;  %v428_v12 = vadd.f32 %v171_v56, %v158_v5  ;;  %v264_v19 = vmul.f32 %v315_v62, %v262_v7 }
  0xdc   :  { %v251_v15 = vadd.f32 %v249_v10, %v237_v9  ;;  %v252_v17 = vadd.f32 %v250_v14, %v238_v13 }
  0xdd   :  { %v430_v16 = vadd.f32 %v172_v8, %v159_v11  ;;  %v184_v20 = vmul.f32 %v428_v12, %v428_v12 }
  0xde   :  { %v438_v23 = vadd.f32 %v263_v18, %v251_v15  ;;  %v440_v24 = vadd.f32 %v264_v19, %v252_v17 }
  0xdf   :  { %v175_v21 = vadd.f32 %v430_v16, %v428_v12  ;;  %v185_v22 = vmul.f32 %v430_v16, %v430_v16 }
  0xe0   :  { %v277_v26 = vmul.f32 %v440_v24, %v440_v24  ;;  %v267_v27 = vadd.f32 %v440_v24, %v438_v23  ;;  %v276_v28 = vmul.f32 %v438_v23, %v438_v23 }
  0xe1   :  { %176 = vadd.xlane.f32.xlu0 %v175_v21  ;;  %v186_v25 = vadd.f32 %v185_v22, %v184_v20 }
  0xe2   :  { %v278_v29 = vadd.f32 %v277_v26, %v276_v28 }
  0xe3   :  { %187 = vadd.xlane.f32.xlu1 %v186_v25 }
  0xe5   :  { %268 = vadd.xlane.f32.xlu0 %v267_v27 }
  0xe7   :  { %279 = vadd.xlane.f32.xlu1 %v278_v29 }
 0x16a   :  { %v177_v30 = vpop.xlane.xlu0 %176 }
 0x16b   :  { %v178_v31 = vrot.slane %v177_v30, 4 }
 0x16c   :  { %v188_v32 = vpop.xlane.xlu1 %187 }
 0x16d   :  { %v179_v33 = vadd.f32 %v178_v31, %v177_v30  ;;  %v189_v34 = vrot.slane %v188_v32, 4 }
 0x16e   :  { %v269_v35 = vpop.xlane.xlu0 %268 }
 0x16f   :  { %v180_v36 = vrot.slane %v179_v33, 2  ;;  %v190_v37 = vadd.f32 %v189_v34, %v188_v32  ;;  %v270_v38 = vrot.slane %v269_v35, 4 }
 0x170   :  { %v280_v39 = vpop.xlane.xlu1 %279 }
 0x171   :  { %v181_v40 = vadd.f32 %v180_v36, %v179_v33  ;;  %v191_v41 = vrot.slane %v190_v37, 2  ;;  %v271_v42 = vadd.f32 %v270_v38, %v269_v35  ;;  %v281_v43 = vrot.slane %v280_v39, 4 }
 0x173   :  { %v182_v44 = vrot.slane %v181_v40, 1  ;;  %v192_v45 = vadd.f32 %v191_v41, %v190_v37  ;;  %v272_v46 = vrot.slane %v271_v42, 2  ;;  %v282_v47 = vadd.f32 %v281_v43, %v280_v39 }
 0x175   :  { %v183_v48 = vadd.f32 %v182_v44, %v181_v40  ;;  %v193_v49 = vrot.slane %v192_v45, 1  ;;  %v273_v50 = vadd.f32 %v272_v46, %v271_v42  ;;  %v283_v51 = vrot.slane %v282_v47, 2 }
 0x177   :  { %v195_v52 = vmul.f32 0.00048828125, %v183_v48  ;;  %v194_v53 = vadd.f32 %v193_v49, %v192_v45  ;;  %v274_v54 = vrot.slane %v273_v50, 1  ;;  %v284_v55 = vadd.f32 %v283_v51, %v282_v47 }
 0x179   :  { %v196_v56 = vmul.f32 0.00048828125, %v194_v53  ;;  %v197_v57 = vmul.f32 %v195_v52, %v195_v52  ;;  %v275_v58 = vadd.f32 %v274_v54, %v273_v50  ;;  %v285_v59 = vrot.slane %v284_v55, 1 }
 0x17a   :  { %v199_v4 = vsub.f32 %v428_v12, %v195_v52  ;;  %v200_v5 = vsub.f32 %v430_v16, %v195_v52 }
 0x17b   :  { %v198_v60 = vsub.f32 %v196_v56, %v197_v57  ;;  %v287_v61 = vmul.f32 0.00048828125, %v275_v58  ;;  %v286_v62 = vadd.f32 %v285_v59, %v284_v55 }
 0x17d   :  { %v201_v63 = vadd.f32 1e-05, %v198_v60  ;;  %v288_v0 = vmul.f32 0.00048828125, %v286_v62  ;;  %v289_v1 = vmul.f32 %v287_v61, %v287_v61  ;;  %v291_v11 = vsub.f32 %v438_v23, %v287_v61 }
 0x17e   :  { %v292_v13 = vsub.f32 %v440_v24, %v287_v61 }
 0x17f   :  { %323 = vrsqrt.f32 %v201_v63  ;;  %v290_v2 = vsub.f32 %v288_v0, %v289_v1 }
 0x181   :  { %v293_v3 = vadd.f32 1e-05, %v290_v2 }
 0x183   :  { %325 = vrsqrt.f32 %v293_v3 }
 0x18c   :  { %v324_v6 = vpop.eup %323 }
 0x18d   :  { %v203_v7 = vmul.f32 %v324_v6, %v199_v4  ;;  %v204_v8 = vmul.f32 %v324_v6, %v200_v5 }
 0x18f   :  { %v205_v9 = vmax.f32 %v203_v7, 0.0  ;;  %v206_v10 = vmax.f32 %v204_v8, 0.0 }
 0x190   :  { %v326_v14 = vpop.eup %325 }
 0x191   :  { %v207_v15 = vmin.f32 %v205_v9, 6.0  ;;  %v208_v17 = vmin.f32 %v206_v10, 6.0  ;;  %v295_v18 = vmul.f32 %v326_v14, %v291_v11  ;;  %v296_v19 = vmul.f32 %v326_v14, %v292_v13 }
 0x193   :  { %209 = vst [vmem:[%s468_s4] sm:$0xff] %v207_v15  ;;  %210 = vst [vmem:[%s468_s4 + $0x8] sm:$0xff] %v208_v17  ;;  %v297_v12 = vmax.f32 %v295_v18, 0.0  ;;  %v298_v16 = vmax.f32 %v296_v19, 0.0 }
 0x195   :  { %v299_v20 = vmin.f32 %v297_v12, 6.0  ;;  %v300_v21 = vmin.f32 %v298_v16, 6.0 }
 0x197   :  { %301 = vst [vmem:[%s468_s4 + $0x10] sm:$0xff] %v299_v20  ;;  %302 = vst [vmem:[%s468_s4 + $0x18] sm:$0xff] %v300_v21 }

</bundles_post_ra>
